<compile_context>
chip_gen: v6e
topology: v6e:2x2x1
jax: 0.10.0
libtpu: 0.0.40
codegen_flags: <defaults>
</compile_context>

<pallas_src>
import jax
import jax.numpy as jnp
from jax.experimental import pallas as pl
from jax.experimental.pallas import tpu as pltpu


def _pointplus_kernel(e_ref, w_ref, shift_ref, o_ref):
    """y = relu(max_k(blockdiag(W*bn_scale) @ edge) + shift); lane-dense over points."""
    # bf16 x bf16 -> f32 accumulate is native on the MXU; no slab upcast.
    h = jnp.dot(w_ref[...], e_ref[...], preferred_element_type=jnp.float32)  # (k*Cout, tm)
    cout = o_ref.shape[0]
    k = h.shape[0] // cout
    m = h[0:cout, :]
    for kk in range(1, k):   # k small & static -> unrolled f32 VPU maxes, no relayouts
        m = jnp.maximum(m, h[kk * cout:(kk + 1) * cout, :])
    # Folded conv-bias + BN shift, then ReLU, once per point (hoisted past the max).
    m = jnp.maximum(m + shift_ref[...], 0.0)
    o_ref[...] = m.astype(o_ref.dtype)


def pointplus_pallas(edge_cf, w_big, shift_cf, *, tm=2048, out_dtype=jnp.float32):
    """edge_cf: (k*Cin, BN); w_big: (k*Cout, k*Cin); shift_cf: (Cout, 1) -> (Cout, BN)."""
    kcin, bn = edge_cf.shape
    kcout = w_big.shape[0]
    cout = shift_cf.shape[0]

    # Lane-dense point tiling. Large tiles amortize the ~0.35us per-grid-step
    # overhead; tm=2048 is plenty on v5e, tm=4096-8192 recommended on v6e/v7x
    # (still only a few MiB of VMEM per step with bf16 edges).
    tm = max(128, int(tm))
    if bn <= tm:
        tm_eff, grid = bn, (1,)            # block == full array: no padding needed
    else:
        tm_eff = (tm // 128) * 128         # multiple of 128 -> unmasked lane-dense stores
        grid = (pl.cdiv(bn, tm_eff),)      # last block may be partial; Pallas masks it

    return pl.pallas_call(
        _pointplus_kernel,
        out_shape=jax.ShapeDtypeStruct((cout, bn), out_dtype),
        grid_spec=pltpu.PrefetchScalarGridSpec(
            num_scalar_prefetch=0,
            grid=grid,
            in_specs=[
                pl.BlockSpec((kcin, tm_eff), lambda i: (0, i)),   # edge slab tile (lane-dense)
                pl.BlockSpec((kcout, kcin), lambda i: (0, 0)),    # block-diag weights (resident)
                pl.BlockSpec((cout, 1), lambda i: (0, 0)),        # per-channel shift (resident)
            ],
            out_specs=pl.BlockSpec((cout, tm_eff), lambda i: (0, i)),
        ),
        compiler_params=pltpu.CompilerParams(
            dimension_semantics=("parallel",),  # shards grid steps across v7x TensorCores
        ),
    )(edge_cf, w_big, shift_cf)


def init_pointplus_params(key, in_channels, out_channels):
    """Deterministic synthetic params: Conv2d(in,out,1) + BatchNorm2d(out)."""
    k1, k2, k3, k4, k5, k6 = jax.random.split(key, 6)
    bound = 1.0 / (in_channels ** 0.5)
    w = jax.random.uniform(k1, (out_channels, in_channels), jnp.float32, -bound, bound)
    b = jax.random.uniform(k2, (out_channels,), jnp.float32, -bound, bound)
    gamma = 1.0 + 0.1 * jax.random.normal(k3, (out_channels,), jnp.float32)
    beta = 0.1 * jax.random.normal(k4, (out_channels,), jnp.float32)
    rmean = 0.1 * jax.random.normal(k5, (out_channels,), jnp.float32)
    rvar = jnp.abs(1.0 + 0.1 * jax.random.normal(k6, (out_channels,), jnp.float32))
    return dict(w=w, b=b, gamma=gamma, beta=beta, running_mean=rmean, running_var=rvar)


def pointplus_forward(x, B, n, id_euc, params, first_layer=False, eps=1e-5,
                      edge_dtype=jnp.bfloat16, out_dtype=jnp.float32,
                      feature_last=True, tm=2048):
    """JAX glue mirroring PointPlus.forward(x, B, n, id_euc)."""
    sid, tid = id_euc
    bn = B * n
    k = sid.shape[0] // bn
    if first_layer:
        xyz, nrm = x[:, :3], x[:, 3:]
        # edge = cat([x_j - x_i, norm_j]) with x_j = xyz[sid], x_i = xyz[tid]
        edge = jnp.concatenate([xyz[sid] - xyz[tid], nrm[sid]], axis=-1)
    else:
        # x_i = x[sid], x_j = x[tid], edge = x_j - x_i
        edge = x[tid] - x[sid]
    cin = edge.shape[-1]
    # Subtraction in f32, then bf16 slab: halves the dominant HBM stream into the kernel.
    if edge_dtype is not None:
        edge = edge.astype(edge_dtype)
    # Channels-first lane-dense slab: row = neighbor*Cin + channel, col = point index.
    # The gather + sub + cast + transpose form one producer pass of edge_cf.
    edge_cf = jnp.transpose(edge.reshape(bn, k, cin), (1, 2, 0)).reshape(k * cin, bn)

    # Fold conv bias + eval-mode BatchNorm into the weights / a per-channel shift.
    scale = params["gamma"] / jnp.sqrt(params["running_var"] + eps)            # (Cout,)
    shift = (params["b"] - params["running_mean"]) * scale + params["beta"]    # (Cout,)
    w_scaled = (params["w"] * scale[:, None]).astype(jnp.float32)              # (Cout, Cin)
    # Block-diagonal expansion: one MXU matmul transforms all k neighbors at once.
    w_big = jnp.kron(jnp.eye(k, dtype=jnp.float32), w_scaled).astype(edge_cf.dtype)

    y_cf = pointplus_pallas(edge_cf, w_big, shift[:, None].astype(jnp.float32),
                            tm=tm, out_dtype=out_dtype)
    # Chained PointPlus layers should pass feature_last=False and transpose once at
    # the network boundary; the .T here is a full extra HBM pass on the output.
    return y_cf.T if feature_last else y_cf  # (B*n, Cout) matches PointPlus.forward


def pointplus_ref(x, B, n, id_euc, params, first_layer=False, eps=1e-5):
    """Pure-JAX reference for correctness checking (mirrors the PyTorch module)."""
    sid, tid = id_euc
    k = sid.shape[0] // (B * n)
    if first_layer:
        xyz, nrm = x[:, :3], x[:, 3:]
        edge = jnp.concatenate([xyz[sid] - xyz[tid], nrm[sid]], axis=-1)
    else:
        edge = x[tid] - x[sid]
    edge = edge.reshape(B, n, k, -1)
    h = jnp.einsum("bnkc,oc->bnko", edge, params["w"]) + params["b"]
    h = (h - params["running_mean"]) / jnp.sqrt(params["running_var"] + eps)
    h = h * params["gamma"] + params["beta"]
    h = jnp.maximum(h, 0.0)
    y = h.max(axis=2)
    return y.reshape(B * n, -1)


if __name__ == "__main__":
    key = jax.random.PRNGKey(0)
    kx, ks, kt, kp, kx2, kp2, kx3, ks3, kt3 = jax.random.split(key, 9)

    # ---- Generic layer: edge = x[tid]-x[sid]; Conv2d(4->32,1)+BN+ReLU; max over k ----
    B, n, k = 2, 16, 8
    num_pts = B * n
    sid_euc = jax.random.randint(ks, (B * n * k,), 0, num_pts, jnp.int32)
    tid_euc = jax.random.randint(kt, (B * n * k,), 0, num_pts, jnp.int32)
    in_c, out_c = 4, 32
    x = jax.random.normal(kx, (num_pts, in_c), jnp.float32)
    params = init_pointplus_params(kp, in_c, out_c)
    y_ref = pointplus_ref(x, B, n, (sid_euc, tid_euc), params, first_layer=False)

    # Exact path (f32 edges) -- tight check vs reference.
    y32 = pointplus_forward(x, B, n, (sid_euc, tid_euc), params, first_layer=False,
                            edge_dtype=jnp.float32)
    y32 = jax.block_until_ready(y32)
    assert y32.shape == (num_pts, out_c), y32.shape
    assert jnp.allclose(y32, y_ref, atol=1e-4, rtol=1e-4), "mismatch vs reference (f32 path)"

    # Default fast path (bf16 edges/weights straight into the MXU) -- looser tolerance.
    y16 = pointplus_forward(x, B, n, (sid_euc, tid_euc), params, first_layer=False)
    y16 = jax.block_until_ready(y16)
    assert jnp.allclose(y16, y_ref, atol=1e-1, rtol=1e-1), "mismatch vs reference (bf16 path)"

    # ---- First layer: x = [xyz | normal]; edge = cat([xyz_j - xyz_i, normal_j]) ----
    in_c_fl, out_c_fl = 6, 32
    x_fl = jax.random.normal(kx2, (num_pts, in_c_fl), jnp.float32)
    params_fl = init_pointplus_params(kp2, in_c_fl, out_c_fl)
    y_fl = pointplus_forward(x_fl, B, n, (sid_euc, tid_euc), params_fl, first_layer=True,
                             edge_dtype=jnp.float32)
    y_fl = jax.block_until_ready(y_fl)
    y_fl_ref = pointplus_ref(x_fl, B, n, (sid_euc, tid_euc), params_fl, first_layer=True)
    assert y_fl.shape == (num_pts, out_c_fl), y_fl.shape
    assert jnp.allclose(y_fl, y_fl_ref, atol=1e-4, rtol=1e-4), "mismatch (first layer)"

    # ---- Multi-tile path with a partial (masked) last block: bn=400, tm=128 ----
    B3, n3 = 2, 200
    num_pts3 = B3 * n3
    sid3 = jax.random.randint(ks3, (num_pts3 * k,), 0, num_pts3, jnp.int32)
    tid3 = jax.random.randint(kt3, (num_pts3 * k,), 0, num_pts3, jnp.int32)
    x3 = jax.random.normal(kx3, (num_pts3, in_c), jnp.float32)
    y3 = pointplus_forward(x3, B3, n3, (sid3, tid3), params, first_layer=False,
                           edge_dtype=jnp.float32, tm=128)
    y3 = jax.block_until_ready(y3)
    y3_ref = pointplus_ref(x3, B3, n3, (sid3, tid3), params, first_layer=False)
    assert y3.shape == (num_pts3, out_c), y3.shape
    assert jnp.allclose(y3, y3_ref, atol=1e-4, rtol=1e-4), "mismatch (partial last block)"

    print("KERNEL_OK")
</pallas_src>

<mosaic_0001>
module attributes {stable_mosaic.version = 11 : i64} {
  func.func @_pointplus_kernel(%arg0: i32, %arg1: memref<32x32xf32, #tpu.memory_space<vmem>>, %arg2: memref<256x32xf32, #tpu.memory_space<vmem>>, %arg3: memref<32x1xf32, #tpu.memory_space<vmem>>, %arg4: memref<32x32xf32, #tpu.memory_space<vmem>>) attributes {dimension_semantics = [#tpu.dimension_semantics<parallel>], iteration_bounds = array<i64: 1>, scalar_prefetch = 0 : i64, scratch_operands = 0 : i64, tpu.core_type = #tpu.core_type<tc>, window_params = [{transform_indices = @transform_0, window_bounds = array<i64: 32, 32>}, {pipeline_mode = #tpu.pipeline_mode<synchronous>, transform_indices = @transform_1, window_bounds = array<i64: 256, 32>}, {pipeline_mode = #tpu.pipeline_mode<synchronous>, transform_indices = @transform_2, window_bounds = array<i64: 32, 1>}, {transform_indices = @transform_3, window_bounds = array<i64: 32, 32>}]} {
    %c0 = arith.constant 0 : index
    %c0_0 = arith.constant 0 : index
    %0 = vector.load %arg2[%c0, %c0_0] : memref<256x32xf32, #tpu.memory_space<vmem>>, vector<256x32xf32>
    %c0_1 = arith.constant 0 : index
    %c0_2 = arith.constant 0 : index
    %1 = vector.load %arg1[%c0_1, %c0_2] : memref<32x32xf32, #tpu.memory_space<vmem>>, vector<32x32xf32>
    %cst = arith.constant dense<0.000000e+00> : vector<256x32xf32>
    %2 = tpu.matmul %0, %1, %cst {dimension_numbers = #tpu.dot_dimension_numbers<[1], [0], [0], [1], [0, 0, 1, 1], [], []>} : vector<256x32xf32>, vector<32x32xf32>, vector<256x32xf32> -> vector<256x32xf32>
    %3 = vector.extract_strided_slice %2 {offsets = [0, 0], sizes = [32, 32], strides = [1, 1]} : vector<256x32xf32> to vector<32x32xf32>
    %4 = vector.extract_strided_slice %2 {offsets = [32, 0], sizes = [32, 32], strides = [1, 1]} : vector<256x32xf32> to vector<32x32xf32>
    %5 = arith.maximumf %3, %4 : vector<32x32xf32>
    %6 = vector.extract_strided_slice %2 {offsets = [64, 0], sizes = [32, 32], strides = [1, 1]} : vector<256x32xf32> to vector<32x32xf32>
    %7 = arith.maximumf %5, %6 : vector<32x32xf32>
    %8 = vector.extract_strided_slice %2 {offsets = [96, 0], sizes = [32, 32], strides = [1, 1]} : vector<256x32xf32> to vector<32x32xf32>
    %9 = arith.maximumf %7, %8 : vector<32x32xf32>
    %10 = vector.extract_strided_slice %2 {offsets = [128, 0], sizes = [32, 32], strides = [1, 1]} : vector<256x32xf32> to vector<32x32xf32>
    %11 = arith.maximumf %9, %10 : vector<32x32xf32>
    %12 = vector.extract_strided_slice %2 {offsets = [160, 0], sizes = [32, 32], strides = [1, 1]} : vector<256x32xf32> to vector<32x32xf32>
    %13 = arith.maximumf %11, %12 : vector<32x32xf32>
    %14 = vector.extract_strided_slice %2 {offsets = [192, 0], sizes = [32, 32], strides = [1, 1]} : vector<256x32xf32> to vector<32x32xf32>
    %15 = arith.maximumf %13, %14 : vector<32x32xf32>
    %16 = vector.extract_strided_slice %2 {offsets = [224, 0], sizes = [32, 32], strides = [1, 1]} : vector<256x32xf32> to vector<32x32xf32>
    %17 = arith.maximumf %15, %16 : vector<32x32xf32>
    %c0_3 = arith.constant 0 : index
    %c0_4 = arith.constant 0 : index
    %18 = vector.load %arg3[%c0_3, %c0_4] : memref<32x1xf32, #tpu.memory_space<vmem>>, vector<32x1xf32>
    %19 = vector.broadcast %18 : vector<32x1xf32> to vector<32x32xf32>
    %20 = arith.addf %17, %19 : vector<32x32xf32>
    %cst_5 = arith.constant 0.000000e+00 : f32
    %21 = vector.broadcast %cst_5 : f32 to vector<32x32xf32>
    %22 = arith.maximumf %20, %21 : vector<32x32xf32>
    %c0_6 = arith.constant 0 : index
    %c0_7 = arith.constant 0 : index
    %23 = vector.load %arg4[%c0_6, %c0_7] : memref<32x32xf32, #tpu.memory_space<vmem>>, vector<32x32xf32>
    tpu.vector_store %arg4[%c0_6, %c0_7], %22 {strides = array<i32>} : memref<32x32xf32, #tpu.memory_space<vmem>>, vector<32x32xf32>,
    return
  }
  func.func @transform_0(%arg0: i32) -> (i32, i32) {
    %c0_i32 = arith.constant 0 : i32
    %c0_i32_0 = arith.constant 0 : i32
    return %c0_i32, %arg0 : i32, i32
  }
  func.func @transform_1(%arg0: i32) -> (i32, i32) {
    %c0_i32 = arith.constant 0 : i32
    %c0_i32_0 = arith.constant 0 : i32
    %c0_i32_1 = arith.constant 0 : i32
    return %c0_i32, %c0_i32_0 : i32, i32
  }
  func.func @transform_2(%arg0: i32) -> (i32, i32) {
    %c0_i32 = arith.constant 0 : i32
    %c0_i32_0 = arith.constant 0 : i32
    %c0_i32_1 = arith.constant 0 : i32
    return %c0_i32, %c0_i32_0 : i32, i32
  }
  func.func @transform_3(%arg0: i32) -> (i32, i32) {
    %c0_i32 = arith.constant 0 : i32
    %c0_i32_0 = arith.constant 0 : i32
    return %c0_i32, %arg0 : i32, i32
  }
}

</mosaic_0001>

<bundles_post_ra>
// kernel: tpu_custom_call.1
= control target key start
LH: loop header
LB: loop body
LE: loop exit
PB: predicated region body
PF: predicated region fallthrough
CT: control target
= control target key end

     0   :  { %vm51_vm0 = vcmask 261120   ;;  %v613_v12 = vmov 0   ;;  %s796_s0 = inlined_call_operand.vmem [shape: f32[32,32], index: 0, kind: input, shape index: {}]   ;;  %s797_s1 = inlined_call_operand.vmem [shape: f32[256,32], index: 1, kind: input, shape index: {}]   ;;  %s798_s2 = inlined_call_operand.vmem [shape: f32[32,1], index: 2, kind: input, shape index: {}]   ;;  %s799_s3 = inlined_call_operand.hbm [shape: f32[32,32], index: 3, kind: output, shape index: {}]  }
   0x1   :  { %v50_v0 = vld [vmem:[%s796_s0 + $0x18] sm:$0xff]  ;;  %v49_v1 = vld [vmem:[%s796_s0 + $0x10] sm:$0xff]  ;;  %v15_v2 = vld [vmem:[%s797_s1] sm:$0xff]  ;;  %589 = vset.pattern.permute.xlu0 %v613_v12  ;;  %590 = vset.pattern.permute.xlu1 %v613_v12 }
   0x2   :  { %521 = vmatprep.subr.mxu0 %v50_v0  ;;  %577 = vmatprep.subr.mxu1 %v50_v0  ;;  %v48_v3 = vld [vmem:[%s796_s0 + $0x8] sm:$0xff]  ;;  %v47_v4 = vld [vmem:[%s796_s0] sm:$0xff]  ;;  %v17_v6 = vld [vmem:[%s797_s1 + $0x10] sm:$0xff] }
   0x3   :  { %522 = vmatpush3.msra.mxu0 %v50_v0  ;;  %581 = vmatpush3.msra.mxu1 %v50_v0  ;;  %v16_v5 = vld [vmem:[%s797_s1 + $0x8] sm:$0xff]  ;;  %v31_v7 = vld [vmem:[%s797_s1 + $0x80] sm:$0xff]  ;;  %v33_v9 = vld [vmem:[%s797_s1 + $0x90] sm:$0xff] }
   0x4   :  { %523 = vmatprep.subr.mxu0 %v49_v1  ;;  %529 = vmatprep.mubr.msk.f32.mxu0 %vm51_vm0, %v15_v2  ;;  %v32_v8 = vld [vmem:[%s797_s1 + $0x88] sm:$0xff]  ;;  %v18_v10 = vld [vmem:[%s797_s1 + $0x18] sm:$0xff]  ;;  %v19_v11 = vld [vmem:[%s797_s1 + $0x20] sm:$0xff] }
   0x5   :  { %524 = vmatpush3.msra.mxu0 %v49_v1  ;;  %578 = vmatprep.subr.mxu1 %v49_v1  ;;  %v34_v13 = vld [vmem:[%s797_s1 + $0x98] sm:$0xff]  ;;  %v401_v14 = vld [vmem:[%s798_s2] sm:$0xff]  ;;  %v403_v15 = vld [vmem:[%s798_s2 + $0x10] sm:$0xff] }
   0x6   :  { %525 = vmatprep.subr.mxu0 %v48_v3  ;;  %582 = vmatpush3.msra.mxu1 %v49_v1  ;;  %v35_v16 = vld [vmem:[%s797_s1 + $0xa0] sm:$0xff] }
   0x7   :  { %526 = vmatpush3.msra.mxu0 %v48_v3  ;;  %579 = vmatprep.subr.mxu1 %v48_v3 }
   0x8   :  { %527 = vmatprep.subr.mxu0 %v47_v4  ;;  %583 = vmatpush3.msra.mxu1 %v48_v3 }
   0x9   :  { %528 = vmatpush3.msra.mxu0 %v47_v4  ;;  %580 = vmatprep.subr.mxu1 %v47_v4 }
   0xa   :  { %530 = vmatmul.mubr.msk.f32.vlgmr.msra.gmra.mxu0 %vm51_vm0, %v16_v5  ;;  %584 = vmatpush3.msra.mxu1 %v47_v4 }
   0xb   :  { %532 = vmatprep.mubr.msk.f32.mxu0 %vm51_vm0, %v17_v6  ;;  %553 = vmatprep.mubr.msk.f32.mxu1 %vm51_vm0, %v31_v7 }
   0xc   :  { %554 = vmatmul.mubr.msk.f32.vlgmr.msra.gmra.mxu1 %vm51_vm0, %v32_v8  ;;  %407 = vperm.xlu0 %589, %v401_v14  }
   0xd   :  { %556 = vmatprep.mubr.msk.f32.mxu1 %vm51_vm0, %v33_v9 }
   0xe   :  { %533 = vmatmul.mubr.msk.f32.gmra.mxu0 %vm51_vm0, %v18_v10 }
   0xf   :  { %8 = vsyncpa [#allocation3], 0  ;;  %535 = vmatprep.mubr.msk.f32.mxu0 %vm51_vm0, %v19_v11  ;;  %v20_v17 = vld [vmem:[%s797_s1 + $0x28] sm:$0xff]  ;;  %417 = vperm.xlu1 %590, %v403_v15   ;;  %v21_v19 = vld [vmem:[%s797_s1 + $0x30] sm:$0xff] }
  0x10   :  { %v402_v18 = vld [vmem:[%s798_s2 + $0x8] sm:$0xff]  ;;  %557 = vmatmul.mubr.msk.f32.gmra.mxu1 %vm51_vm0, %v34_v13  ;;  %v404_v20 = vld [vmem:[%s798_s2 + $0x18] sm:$0xff]  ;;  %v37_v22 = vld [vmem:[%s797_s1 + $0xb0] sm:$0xff] }
  0x11   :  { %559 = vmatprep.mubr.msk.f32.mxu1 %vm51_vm0, %v35_v16  ;;  %v36_v21 = vld [vmem:[%s797_s1 + $0xa8] sm:$0xff]  ;;  %412 = vperm.xlu0 %589, %v402_v18   ;;  %v22_v23 = vld [vmem:[%s797_s1 + $0x38] sm:$0xff]  ;;  %v23_v24 = vld [vmem:[%s797_s1 + $0x40] sm:$0xff] }
  0x12   :  { %536 = vmatmul.mubr.msk.f32.gmra.mxu0 %vm51_vm0, %v20_v17  ;;  %v38_v25 = vld [vmem:[%s797_s1 + $0xb8] sm:$0xff]  ;;  %v39_v26 = vld [vmem:[%s797_s1 + $0xc0] sm:$0xff]  ;;  %v24_v27 = vld [vmem:[%s797_s1 + $0x48] sm:$0xff] }
  0x13   :  { %538 = vmatprep.mubr.msk.f32.mxu0 %vm51_vm0, %v21_v19  ;;  %422 = vperm.xlu1 %590, %v404_v20   ;;  %v25_v28 = vld [vmem:[%s797_s1 + $0x50] sm:$0xff]  ;;  %v40_v29 = vld [vmem:[%s797_s1 + $0xc8] sm:$0xff]  ;;  %v26_v31 = vld [vmem:[%s797_s1 + $0x58] sm:$0xff] }
  0x14   :  { %560 = vmatmul.mubr.msk.f32.gmra.mxu1 %vm51_vm0, %v36_v21  ;;  %v41_v30 = vld [vmem:[%s797_s1 + $0xd0] sm:$0xff]  ;;  %v27_v32 = vld [vmem:[%s797_s1 + $0x60] sm:$0xff]  ;;  %v42_v33 = vld [vmem:[%s797_s1 + $0xd8] sm:$0xff] }
  0x15   :  { %562 = vmatprep.mubr.msk.f32.mxu1 %vm51_vm0, %v37_v22  ;;  %v43_v34 = vld [vmem:[%s797_s1 + $0xe0] sm:$0xff]  ;;  %v28_v35 = vld [vmem:[%s797_s1 + $0x68] sm:$0xff]  ;;  %v29_v36 = vld [vmem:[%s797_s1 + $0x70] sm:$0xff] }
  0x16   :  { %539 = vmatmul.mubr.msk.f32.gmra.mxu0 %vm51_vm0, %v22_v23  ;;  %v44_v37 = vld [vmem:[%s797_s1 + $0xe8] sm:$0xff]  ;;  %v45_v38 = vld [vmem:[%s797_s1 + $0xf0] sm:$0xff]  ;;  %v30_v39 = vld [vmem:[%s797_s1 + $0x78] sm:$0xff] }
  0x17   :  { %541 = vmatprep.mubr.msk.f32.mxu0 %vm51_vm0, %v23_v24  ;;  %v46_v40 = vld [vmem:[%s797_s1 + $0xf8] sm:$0xff]  ;;  %s614_s1 = smov [#allocation2]  }
  0x18   :  { %563 = vmatmul.mubr.msk.f32.gmra.mxu1 %vm51_vm0, %v38_v25  ;;  %s442_s6 = sshll.u32 %s614_s1, 4  ;;  %s443_s6 = int_to_ptr.vmem [resolvable:$true] %s442_s6 }
  0x19   :  { %565 = vmatprep.mubr.msk.f32.mxu1 %vm51_vm0, %v39_v26  ;;  %s591_s7 = scalar_lea.vmem %s443_s6, 512  ;;  %p596_p1 = scmp.lt.s32.totalorder %s443_s6, %s443_s6 }
  0x1a   :  { %542 = vmatmul.mubr.msk.f32.gmra.mxu0 %vm51_vm0, %v24_v27  ;;  %p592_p0 = scmp.ne.s32.totalorder %s443_s6, %s591_s7  ;;  %p597_p2 = scmp.lt.s32.totalorder %s591_s7, %s591_s7 }
  0x1b   :  { %544 = vmatprep.mubr.msk.f32.mxu0 %vm51_vm0, %v25_v28 }
  0x1c   :  { %566 = vmatmul.mubr.msk.f32.gmra.mxu1 %vm51_vm0, %v40_v29  ;;  %p598_p3 = por %p597_p2, %p596_p1 }
  0x1d   :  { %568 = vmatprep.mubr.msk.f32.mxu1 %vm51_vm0, %v41_v30 }
  0x1e   :  { %545 = vmatmul.mubr.msk.f32.gmra.mxu0 %vm51_vm0, %v26_v31  ;;  %p599_p4 = pnand %p598_p3, %p592_p0 }
  0x1f   :  { %547 = vmatprep.mubr.msk.f32.mxu0 %vm51_vm0, %v27_v32 }
  0x20   :  { %569 = vmatmul.mubr.msk.f32.gmra.mxu1 %vm51_vm0, %v42_v33 }
  0x21   :  { %571 = vmatprep.mubr.msk.f32.mxu1 %vm51_vm0, %v43_v34 }
  0x22   :  { %548 = vmatmul.mubr.msk.f32.gmra.mxu0 %vm51_vm0, %v28_v35 }
  0x23   :  { %550 = vmatprep.mubr.msk.f32.mxu0 %vm51_vm0, %v29_v36 }
  0x24   :  { %572 = vmatmul.mubr.msk.f32.gmra.mxu1 %vm51_vm0, %v44_v37 }
  0x25   :  { %574 = vmatprep.mubr.msk.f32.mxu1 %vm51_vm0, %v45_v38 }
  0x26   :  { %551 = vmatmul.mubr.msk.f32.gmra.mxu0 %vm51_vm0, %v30_v39 }
  0x28   :  { %575 = vmatmul.mubr.msk.f32.gmra.mxu1 %vm51_vm0, %v46_v40 }
  0x87   :  { %v408_v8 = vpop.permute.xlu0 %407 }
  0x8a   :  { %v418_v26 = vpop.permute.xlu1 %417 }
  0x8c   :  { %v413_v27 = vpop.permute.xlu0 %412 }
  0xca   :  { %v531_v41 = vpop.f32.mrf.mxu0 }
  0xcc   :  { %v214_v42 = vpop.f32.mrf.mxu0  ;;  %v555_v43 = vpop.f32.mrf.mxu1 }
  0xce   :  { %v534_v44 = vpop.f32.mrf.mxu0  ;;  %v294_v45 = vpop.f32.mrf.mxu1 }
  0xd0   :  { %v224_v46 = vpop.f32.mrf.mxu0  ;;  %v558_v47 = vpop.f32.mrf.mxu1 }
  0xd2   :  { %v537_v48 = vpop.f32.mrf.mxu0  ;;  %v304_v49 = vpop.f32.mrf.mxu1 }
  0xd3   :  { %v374_v62 = vmax.f32 %v531_v41, %v537_v48  ;;  %v423_v41 = vpop.permute.xlu1 %422 }
  0xd4   :  { %v234_v50 = vpop.f32.mrf.mxu0  ;;  %v561_v51 = vpop.f32.mrf.mxu1 }
  0xd5   :  { %v373_v1 = vmax.f32 %v214_v42, %v234_v50 }
  0xd6   :  { %v540_v52 = vpop.f32.mrf.mxu0  ;;  %v314_v53 = vpop.f32.mrf.mxu1 }
  0xd7   :  { %v376_v5 = vmax.f32 %v534_v44, %v540_v52 }
  0xd8   :  { %v244_v54 = vpop.f32.mrf.mxu0  ;;  %v564_v55 = vpop.f32.mrf.mxu1 }
  0xd9   :  { %v375_v11 = vmax.f32 %v224_v46, %v244_v54 }
  0xda   :  { %v543_v56 = vpop.f32.mrf.mxu0  ;;  %v324_v57 = vpop.f32.mrf.mxu1 }
  0xdb   :  { %v378_v2 = vmax.f32 %v374_v62, %v543_v56 }
  0xdc   :  { %v254_v58 = vpop.f32.mrf.mxu0  ;;  %v567_v59 = vpop.f32.mrf.mxu1 }
  0xdd   :  { %v377_v6 = vmax.f32 %v373_v1, %v254_v58 }
  0xde   :  { %v546_v60 = vpop.f32.mrf.mxu0  ;;  %v334_v61 = vpop.f32.mrf.mxu1 }
  0xdf   :  { %v380_v12 = vmax.f32 %v376_v5, %v546_v60 }
  0xe0   :  { %v264_v63 = vpop.f32.mrf.mxu0  ;;  %v570_v0 = vpop.f32.mrf.mxu1 }
  0xe1   :  { %v379_v16 = vmax.f32 %v375_v11, %v264_v63 }
  0xe2   :  { %v549_v3 = vpop.f32.mrf.mxu0  ;;  %v344_v4 = vpop.f32.mrf.mxu1 }
  0xe3   :  { %v382_v7 = vmax.f32 %v378_v2, %v549_v3 }
  0xe4   :  { %v274_v9 = vpop.f32.mrf.mxu0  ;;  %v573_v10 = vpop.f32.mrf.mxu1 }
  0xe5   :  { %v386_v13 = vmax.f32 %v382_v7, %v555_v43  ;;  %v381_v14 = vmax.f32 %v377_v6, %v274_v9 }
  0xe6   :  { %v552_v15 = vpop.f32.mrf.mxu0  ;;  %v354_v21 = vpop.f32.mrf.mxu1 }
  0xe7   :  { %v385_v17 = vmax.f32 %v381_v14, %v294_v45  ;;  %v384_v18 = vmax.f32 %v380_v12, %v552_v15  ;;  %v390_v19 = vmax.f32 %v386_v13, %v561_v51 }
  0xe8   :  { %v284_v20 = vpop.f32.mrf.mxu0  ;;  %v576_v32 = vpop.f32.mrf.mxu1 }
  0xe9   :  { %v388_v22 = vmax.f32 %v384_v18, %v558_v47  ;;  %v383_v23 = vmax.f32 %v379_v16, %v284_v20  ;;  %v394_v24 = vmax.f32 %v390_v19, %v567_v59  ;;  %v389_v25 = vmax.f32 %v385_v17, %v314_v53 }
  0xea   :  { %v364_v42 = vpop.f32.mrf.mxu1 }
  0xeb   :  { %v387_v28 = vmax.f32 %v383_v23, %v304_v49  ;;  %v398_v29 = vmax.f32 %v394_v24, %v573_v10  ;;  %v393_v30 = vmax.f32 %v389_v25, %v334_v61  ;;  %v392_v31 = vmax.f32 %v388_v22, %v564_v55 }
  0xed   :  { %v397_v33 = vmax.f32 %v393_v30, %v354_v21  ;;  %v426_v34 = vadd.f32 %v413_v27, %v398_v29  ;;  %v396_v35 = vmax.f32 %v392_v31, %v570_v0  ;;  %v391_v36 = vmax.f32 %v387_v28, %v324_v57 }
  0xef   :  { %v425_v37 = vadd.f32 %v408_v8, %v397_v33  ;;  %v430_v38 = vmax.f32 %v426_v34, 0.0  ;;  %v400_v39 = vmax.f32 %v396_v35, %v576_v32  ;;  %v395_v40 = vmax.f32 %v391_v36, %v344_v4 }
  0xf1   :  { %v429_v43 = vmax.f32 %v425_v37, 0.0  ;;  %434 = vst.msk [vmem:[#allocation2 + $0x8] sm:$0xff] %vm51_vm0, %v430_v38  ;;  %v428_v44 = vadd.f32 %v423_v41, %v400_v39  ;;  %v399_v45 = vmax.f32 %v395_v40, %v364_v42 }
  0xf3   :  { %433 = vst.msk [vmem:[#allocation2] sm:$0xff] %vm51_vm0, %v429_v43  ;;  %v432_v46 = vmax.f32 %v428_v44, 0.0  ;;  %v427_v47 = vadd.f32 %v418_v26, %v399_v45 }
  0xf5   :  { %436 = vst.msk [vmem:[#allocation2 + $0x18] sm:$0xff] %vm51_vm0, %v432_v46  ;;  %v431_v48 = vmax.f32 %v427_v47, 0.0 }
  0xf7   :  { %435 = vst.msk [vmem:[#allocation2 + $0x10] sm:$0xff] %vm51_vm0, %v431_v48 }
  0xf8   :  { %602 = shalt.err (!%p599_p4)
}
  0xf9   :  { %s615_s8 = smov 128   ;;  %s616_s9 = smov 8  }
  0xfa   :  { %448 = dma.vmem_to_hbm [thread:$0]  %s443_s6, 512, %s799_s3, [#allocation3], %s615_s8, %s615_s8, %s616_s9  }
  0xfb   :  { %611 = dma.done.wait [#allocation3], 512  }
  0xfc   :  { %612 = vsyncadd [#allocation3], 4294966784 }
  0xfd   :  { %452 = vsyncpa [#allocation3], 1 }

</bundles_post_ra>
